<compile_context>
chip_gen: v5e
topology: v5e:2x2
jax: 0.10.0
libtpu: 0.0.40
codegen_flags: <defaults>
</compile_context>

<pallas_src>
import functools

import jax
import jax.numpy as jnp
from jax.experimental import pallas as pl
from jax.experimental.pallas import tpu as pltpu


def _gelu_tanh(z):
    # tanh-approximated GELU (matches torch's approximate='tanh').
    c = 0.7978845608028654  # sqrt(2/pi)
    return 0.5 * z * (1.0 + jnp.tanh(c * (z + 0.044715 * z * z * z)))


def _linear_gelu_bias_kernel(x_ref, w_ref, b_ref, o_ref, acc_ref):
    k = pl.program_id(2)
    prod = jnp.dot(x_ref[...], w_ref[...], preferred_element_type=jnp.float32)

    @pl.when(k == 0)
    def _init():
        acc_ref[...] = prod  # direct write: saves a zero + accumulate pass

    @pl.when(k > 0)
    def _accum():
        acc_ref[...] += prod

    @pl.when(k == pl.num_programs(2) - 1)
    def _finalize():
        z = acc_ref[...] + b_ref[...].astype(jnp.float32)
        o_ref[...] = _gelu_tanh(z).astype(o_ref.dtype)


def _linear_gelu_kernel(x_ref, w_ref, o_ref, acc_ref):
    k = pl.program_id(2)
    prod = jnp.dot(x_ref[...], w_ref[...], preferred_element_type=jnp.float32)

    @pl.when(k == 0)
    def _init():
        acc_ref[...] = prod

    @pl.when(k > 0)
    def _accum():
        acc_ref[...] += prod

    @pl.when(k == pl.num_programs(2) - 1)
    def _finalize():
        o_ref[...] = _gelu_tanh(acc_ref[...]).astype(o_ref.dtype)


# ----------------------------- tiling helpers -------------------------------

_VMEM_TILE_BUDGET = 36 * 1024 * 1024   # safe on v5e/v6e (128 MiB) and v7x (64 MiB/TC)
_VMEM_LIMIT_CAP = 48 * 1024 * 1024


def _cdiv(a, b):
    return -(-a // b)


def _round_up(v, m):
    return _cdiv(v, m) * m


def _pick_tile(dim, target, align):
    """Balanced tile size (multiple of `align`) that minimizes pad waste.

    When `dim` is already `align`-aligned, prefer a tile that divides `dim`
    exactly so the corresponding operand needs no padding (avoids the per-call
    jnp.pad weight copy in HBM)."""
    if dim <= target:
        return _round_up(dim, align)
    nt = _cdiv(dim, target)
    if dim % align == 0:
        for n in range(nt, 2 * nt + 1):
            if dim % n == 0 and (dim // n) % align == 0:
                return dim // n
    return _round_up(_cdiv(dim, nt), align)


def _tiles_vmem_bytes(tm, tn, tk, x_b, w_b, o_b, has_bias):
    x_t = tm * tk * x_b
    w_t = tk * tn * w_b
    b_t = (tn * 4) if has_bias else 0
    o_t = tm * tn * o_b
    acc = tm * tn * 4
    # double-buffered inputs & output + single f32 accumulator
    return 2 * (x_t + w_t + b_t) + 2 * o_t + acc


def _shrink_to_budget(tm_, tn_, tk_, sub, x_b, w_b, o_b, has_bias, budget):
    while _tiles_vmem_bytes(tm_, tn_, tk_, x_b, w_b, o_b, has_bias) > budget:
        if tk_ > 512:
            tk_ = _round_up(_cdiv(tk_, 2), 128)
        elif tn_ > 512:
            tn_ = _round_up(_cdiv(tn_, 2), 128)
        elif tk_ > 128:
            tk_ = _round_up(_cdiv(tk_, 2), 128)
        elif tn_ > 128:
            tn_ = _round_up(_cdiv(tn_, 2), 128)
        elif tm_ > sub:
            tm_ = max(_round_up(_cdiv(tm_, 2), sub), sub)
        else:
            break
    return tm_, tn_, tk_


# --------------------------------- wrapper ----------------------------------

@functools.partial(jax.jit, static_argnames=("tm", "tn", "tk", "compute_dtype"))
def ipex_linear_gelu(x, weight, bias=None, *, tm=512, tn=1024, tk=1024,
                     compute_dtype=None):
    """x: (..., K), weight: (K, N), bias: (N,) or None -> gelu_tanh(x @ W + b).

    `compute_dtype=jnp.bfloat16` enables the MXU-native bf16 path (f32
    accumulation, output stays in x.dtype)."""
    K, N = weight.shape
    lead = x.shape[:-1]
    M = 1
    for d in lead:
        M *= d
    out_dtype = x.dtype

    x2 = x.reshape(M, K)
    w2 = weight
    if compute_dtype is not None:
        x2 = x2.astype(compute_dtype)
        w2 = w2.astype(compute_dtype)

    x_b = jnp.dtype(x2.dtype).itemsize
    w_b = jnp.dtype(w2.dtype).itemsize
    o_b = jnp.dtype(out_dtype).itemsize
    sub = max(8, 32 // x_b)          # sublane multiple: 8 for f32, 16 for bf16
    has_bias = bias is not None

    # -------- balanced, pad-minimizing tile selection --------
    tm_ = _pick_tile(M, tm, sub)
    tn_ = _pick_tile(N, tn, 128)
    tk_ = _pick_tile(K, tk, 128)
    grid_m = _cdiv(M, tm_)

    if grid_m == 1:
        # Small-M / decode regime: weight-bandwidth bound.  Grow N/K tiles so
        # the weight streams through with the fewest grid steps.
        tn_ = _pick_tile(N, max(tn, 2048), 128)
        tk_ = _pick_tile(K, max(tk, 2048), 128)
        # Keep >= 2 parallel tiles so v7x's second TensorCore isn't idle.
        if _cdiv(N, tn_) == 1 and N >= 512:
            tn_ = _pick_tile(N, _round_up(_cdiv(N, 2), 128), 128)

    tm_, tn_, tk_ = _shrink_to_budget(
        tm_, tn_, tk_, sub, x_b, w_b, o_b, has_bias, _VMEM_TILE_BUDGET)

    Mp = _round_up(M, tm_)
    Np = _round_up(N, tn_)
    Kp = _round_up(K, tk_)

    # Pad only when unavoidable (tile picker keeps typical 128-aligned linear
    # shapes pad-free, so the weight is NOT copied per call in that case).
    if (Mp, Kp) != (M, K):
        x2 = jnp.pad(x2, ((0, Mp - M), (0, Kp - K)))
    if (Kp, Np) != (K, N):
        w2 = jnp.pad(w2, ((0, Kp - K), (0, Np - N)))

    grid = (Mp // tm_, Np // tn_, Kp // tk_)   # reduction axis last
    grid_m, grid_n, grid_k = grid

    x_spec = pl.BlockSpec((tm_, tk_), lambda i, j, k: (i, k))
    w_spec = pl.BlockSpec((tk_, tn_), lambda i, j, k: (k, j))
    out_spec = pl.BlockSpec((tm_, tn_), lambda i, j, k: (i, j))
    scratch = [pltpu.VMEM((tm_, tn_), jnp.float32)]

    vmem_bytes = _tiles_vmem_bytes(tm_, tn_, tk_, x_b, w_b, o_b, has_bias)
    vmem_limit = max(32 * 1024 * 1024, min(vmem_bytes * 5 // 4, _VMEM_LIMIT_CAP))
    cparams = pltpu.CompilerParams(
        dimension_semantics=("parallel", "parallel", "arbitrary"),
        vmem_limit_bytes=vmem_limit,
    )

    bias_bytes = 0 if bias is None else Np * jnp.dtype(bias.dtype).itemsize
    cost = pl.CostEstimate(
        flops=2 * Mp * Np * Kp,
        transcendentals=Mp * Np,                      # one tanh per output elem
        bytes_accessed=(
            Mp * Kp * x_b * grid_n                    # x re-read per N tile
            + Kp * Np * w_b * grid_m                  # w re-read per M tile
            + bias_bytes * grid_m
            + Mp * Np * o_b
        ),
    )

    if has_bias:
        b2 = bias.reshape(1, N)
        if Np != N:
            b2 = jnp.pad(b2, ((0, 0), (0, Np - N)))
        b_spec = pl.BlockSpec((1, tn_), lambda i, j, k: (0, j))
        out2 = pl.pallas_call(
            _linear_gelu_bias_kernel,
            out_shape=jax.ShapeDtypeStruct((Mp, Np), out_dtype),
            grid_spec=pltpu.PrefetchScalarGridSpec(
                num_scalar_prefetch=0,
                grid=grid,
                in_specs=[x_spec, w_spec, b_spec],
                out_specs=out_spec,
                scratch_shapes=scratch,
            ),
            compiler_params=cparams,
            cost_estimate=cost,
        )(x2, w2, b2)
    else:
        out2 = pl.pallas_call(
            _linear_gelu_kernel,
            out_shape=jax.ShapeDtypeStruct((Mp, Np), out_dtype),
            grid_spec=pltpu.PrefetchScalarGridSpec(
                num_scalar_prefetch=0,
                grid=grid,
                in_specs=[x_spec, w_spec],
                out_specs=out_spec,
                scratch_shapes=scratch,
            ),
            compiler_params=cparams,
            cost_estimate=cost,
        )(x2, w2)

    out2 = out2[:M, :N]
    return out2.reshape(*lead, N)


if __name__ == "__main__":
    # Small shapes consistent with the linear layer: batch=2, seq=8, hidden=32.
    B, S, IN, OUT = 2, 8, 32, 32
    key = jax.random.PRNGKey(0)
    kx, kw, kb, kx2, kw2, kb2 = jax.random.split(key, 6)

    x = jax.random.normal(kx, (B, S, IN), dtype=jnp.float32)
    # PyTorch Linear weight is (OUT, IN); the fusion module stores
    # weight.transpose(0, 1).contiguous() -> (IN, OUT).
    w_linear = jax.random.normal(kw, (OUT, IN), dtype=jnp.float32) * 0.05
    weight = jnp.transpose(w_linear, (1, 0))  # (IN, OUT)
    bias = jax.random.normal(kb, (OUT,), dtype=jnp.float32) * 0.01

    def ref_gelu(z):
        return jax.nn.gelu(z, approximate=True)

    out = jax.block_until_ready(ipex_linear_gelu(x, weight, bias))
    ref = ref_gelu(
        jnp.dot(x, weight, precision=jax.lax.Precision.HIGHEST) + bias
    )
    assert out.shape == (B, S, OUT)
    assert jnp.allclose(out, ref, atol=2e-3, rtol=2e-3)

    # bias=None path.
    out_nb = jax.block_until_ready(ipex_linear_gelu(x, weight, None))
    ref_nb = ref_gelu(jnp.dot(x, weight, precision=jax.lax.Precision.HIGHEST))
    assert jnp.allclose(out_nb, ref_nb, atol=2e-3, rtol=2e-3)

    # Multi-tile grid (exercises K-accumulation with direct-write init), small:
    # M=64, K=256, N=256 with forced small tiles -> grid (2, 2, 2).
    xb = jax.random.normal(kx2, (4, 16, 256), dtype=jnp.float32)
    wb = jax.random.normal(kw2, (256, 256), dtype=jnp.float32) * 0.05
    bb = jax.random.normal(kb2, (256,), dtype=jnp.float32) * 0.01
    out_b = jax.block_until_ready(
        ipex_linear_gelu(xb, wb, bb, tm=32, tn=128, tk=128)
    )
    ref_b = ref_gelu(
        jnp.dot(xb, wb, precision=jax.lax.Precision.HIGHEST) + bb
    )
    assert jnp.allclose(out_b, ref_b, atol=2e-3, rtol=2e-3)

    # Optional bf16 compute path (MXU-native), f32 accumulation.
    out_bf = jax.block_until_ready(
        ipex_linear_gelu(xb, wb, bb, compute_dtype=jnp.bfloat16)
    )
    assert jnp.allclose(out_bf, ref_b, atol=2e-2, rtol=2e-2)

    print("KERNEL_OK")
</pallas_src>

<mosaic_0001>
module attributes {stable_mosaic.version = 11 : i64} {
  func.func @_linear_gelu_bias_kernel(%arg0: i32, %arg1: i32, %arg2: i32, %arg3: memref<16x128xf32, #tpu.memory_space<vmem>>, %arg4: memref<128x128xf32, #tpu.memory_space<vmem>>, %arg5: memref<1x128xf32, #tpu.memory_space<vmem>>, %arg6: memref<16x128xf32, #tpu.memory_space<vmem>>, %arg7: memref<16x128xf32, #tpu.memory_space<vmem>>) attributes {dimension_semantics = [#tpu.dimension_semantics<parallel>, #tpu.dimension_semantics<parallel>, #tpu.dimension_semantics<arbitrary>], iteration_bounds = array<i64: 1, 1, 1>, scalar_prefetch = 0 : i64, scratch_operands = 1 : i64, tpu.core_type = #tpu.core_type<tc>, window_params = [{transform_indices = @transform_0, window_bounds = array<i64: 16, 128>}, {transform_indices = @transform_1, window_bounds = array<i64: 128, 128>}, {transform_indices = @transform_2, window_bounds = array<i64: 1, 128>}, {transform_indices = @transform_3, window_bounds = array<i64: 16, 128>}]} {
    %c0 = arith.constant 0 : index
    %c0_0 = arith.constant 0 : index
    %0 = vector.load %arg3[%c0, %c0_0] : memref<16x128xf32, #tpu.memory_space<vmem>>, vector<16x128xf32>
    %c0_1 = arith.constant 0 : index
    %c0_2 = arith.constant 0 : index
    %1 = vector.load %arg4[%c0_1, %c0_2] : memref<128x128xf32, #tpu.memory_space<vmem>>, vector<128x128xf32>
    %cst = arith.constant dense<0.000000e+00> : vector<16x128xf32>
    %2 = tpu.matmul %0, %1, %cst {dimension_numbers = #tpu.dot_dimension_numbers<[1], [0], [0], [1], [0, 0, 1, 1], [], []>} : vector<16x128xf32>, vector<128x128xf32>, vector<16x128xf32> -> vector<16x128xf32>
    %c0_i32 = arith.constant 0 : i32
    %3 = arith.cmpi eq, %arg2, %c0_i32 : i32
    %4 = arith.extui %3 : i1 to i32
    %c0_i32_3 = arith.constant 0 : i32
    %5 = arith.cmpi ne, %4, %c0_i32_3 : i32
    scf.if %5 {
      %c0_8 = arith.constant 0 : index
      %c0_9 = arith.constant 0 : index
      %12 = vector.load %arg7[%c0_8, %c0_9] : memref<16x128xf32, #tpu.memory_space<vmem>>, vector<16x128xf32>
      tpu.vector_store %arg7[%c0_8, %c0_9], %2 {strides = array<i32>} : memref<16x128xf32, #tpu.memory_space<vmem>>, vector<16x128xf32>,
    } else {
    }
    %c0_i32_4 = arith.constant 0 : i32
    %6 = arith.cmpi sgt, %arg2, %c0_i32_4 : i32
    %7 = arith.extui %6 : i1 to i32
    %c0_i32_5 = arith.constant 0 : i32
    %8 = arith.cmpi ne, %7, %c0_i32_5 : i32
    scf.if %8 {
      %c0_8 = arith.constant 0 : index
      %c0_9 = arith.constant 0 : index
      %12 = vector.load %arg7[%c0_8, %c0_9] : memref<16x128xf32, #tpu.memory_space<vmem>>, vector<16x128xf32>
      %13 = arith.addf %12, %2 : vector<16x128xf32>
      %c0_10 = arith.constant 0 : index
      %c0_11 = arith.constant 0 : index
      %14 = vector.load %arg7[%c0_10, %c0_11] : memref<16x128xf32, #tpu.memory_space<vmem>>, vector<16x128xf32>
      tpu.vector_store %arg7[%c0_10, %c0_11], %13 {strides = array<i32>} : memref<16x128xf32, #tpu.memory_space<vmem>>, vector<16x128xf32>,
    } else {
    }
    %c0_i32_6 = arith.constant 0 : i32
    %9 = arith.cmpi eq, %arg2, %c0_i32_6 : i32
    %10 = arith.extui %9 : i1 to i32
    %c0_i32_7 = arith.constant 0 : i32
    %11 = arith.cmpi ne, %10, %c0_i32_7 : i32
    scf.if %11 {
      %c0_8 = arith.constant 0 : index
      %c0_9 = arith.constant 0 : index
      %12 = vector.load %arg7[%c0_8, %c0_9] : memref<16x128xf32, #tpu.memory_space<vmem>>, vector<16x128xf32>
      %c0_10 = arith.constant 0 : index
      %c0_11 = arith.constant 0 : index
      %13 = vector.load %arg5[%c0_10, %c0_11] : memref<1x128xf32, #tpu.memory_space<vmem>>, vector<1x128xf32>
      %14 = vector.broadcast %13 : vector<1x128xf32> to vector<16x128xf32>
      %15 = arith.addf %12, %14 : vector<16x128xf32>
      %cst_12 = arith.constant 5.000000e-01 : f32
      %16 = vector.broadcast %cst_12 : f32 to vector<16x128xf32>
      %17 = arith.mulf %16, %15 : vector<16x128xf32>
      %cst_13 = arith.constant 4.471500e-02 : f32
      %18 = vector.broadcast %cst_13 : f32 to vector<16x128xf32>
      %19 = arith.mulf %18, %15 : vector<16x128xf32>
      %20 = arith.mulf %19, %15 : vector<16x128xf32>
      %21 = arith.mulf %20, %15 : vector<16x128xf32>
      %22 = arith.addf %15, %21 : vector<16x128xf32>
      %cst_14 = arith.constant 0.797884583 : f32
      %23 = vector.broadcast %cst_14 : f32 to vector<16x128xf32>
      %24 = arith.mulf %23, %22 : vector<16x128xf32>
      %25 = math.tanh %24 : vector<16x128xf32>
      %cst_15 = arith.constant 1.000000e+00 : f32
      %26 = vector.broadcast %cst_15 : f32 to vector<16x128xf32>
      %27 = arith.addf %26, %25 : vector<16x128xf32>
      %28 = arith.mulf %17, %27 : vector<16x128xf32>
      %c0_16 = arith.constant 0 : index
      %c0_17 = arith.constant 0 : index
      %29 = vector.load %arg6[%c0_16, %c0_17] : memref<16x128xf32, #tpu.memory_space<vmem>>, vector<16x128xf32>
      tpu.vector_store %arg6[%c0_16, %c0_17], %28 {strides = array<i32>} : memref<16x128xf32, #tpu.memory_space<vmem>>, vector<16x128xf32>,
    } else {
    }
    return
  }
  func.func @transform_0(%arg0: i32, %arg1: i32, %arg2: i32) -> (i32, i32) {
    %c0_i32 = arith.constant 0 : i32
    return %arg0, %arg2 : i32, i32
  }
  func.func @transform_1(%arg0: i32, %arg1: i32, %arg2: i32) -> (i32, i32) {
    %c0_i32 = arith.constant 0 : i32
    return %arg2, %arg1 : i32, i32
  }
  func.func @transform_2(%arg0: i32, %arg1: i32, %arg2: i32) -> (i32, i32) {
    %c0_i32 = arith.constant 0 : i32
    %c0_i32_0 = arith.constant 0 : i32
    return %c0_i32, %arg1 : i32, i32
  }
  func.func @transform_3(%arg0: i32, %arg1: i32, %arg2: i32) -> (i32, i32) {
    %c0_i32 = arith.constant 0 : i32
    return %arg0, %arg1 : i32, i32
  }
}

</mosaic_0001>

<bundles_post_ra>
// kernel: ipex_linear_gelu.1
= control target key start
LH: loop header
LB: loop body
LE: loop exit
PB: predicated region body
PF: predicated region fallthrough
CT: control target
= control target key end

     0   :  { %s210_s1 = inlined_call_operand.vmem [shape: f32[128,128], index: 1, kind: input, shape index: {}]   ;;  %s211_s2 = inlined_call_operand.vmem [shape: f32[1,128], index: 2, kind: input, shape index: {}]   ;;  %s212_s0 = inlined_call_operand.vmem [shape: f32[16,128], index: 0, kind: input, shape index: {}]   ;;  %s213_s3 = inlined_call_operand.vmem [shape: f32[16,128], index: 3, kind: output, shape index: {}]  }
   0x1   :  { %v31_v0 = vld [vmem:[%s210_s1 + $0x78] sm:$0xff]  ;;  %v30_v1 = vld [vmem:[%s210_s1 + $0x70] sm:$0xff]  ;;  %v29_v2 = vld [vmem:[%s210_s1 + $0x68] sm:$0xff] }
   0x2   :  { %32 = vmatpush.msra.mxu0 %v31_v0  ;;  %106 = vmatpush.msra.mxu1 %v31_v0  ;;  %v28_v3 = vld [vmem:[%s210_s1 + $0x60] sm:$0xff]  ;;  %v27_v4 = vld [vmem:[%s210_s1 + $0x58] sm:$0xff]  ;;  %v26_v5 = vld [vmem:[%s210_s1 + $0x50] sm:$0xff] }
   0x3   :  { %v25_v6 = vld [vmem:[%s210_s1 + $0x48] sm:$0xff]  ;;  %v24_v7 = vld [vmem:[%s210_s1 + $0x40] sm:$0xff]  ;;  %v23_v8 = vld [vmem:[%s210_s1 + $0x38] sm:$0xff] }
   0x4   :  { %33 = vmatpush.msra.mxu0 %v30_v1  ;;  %107 = vmatpush.msra.mxu1 %v30_v1  ;;  %v22_v9 = vld [vmem:[%s210_s1 + $0x30] sm:$0xff]  ;;  %v21_v10 = vld [vmem:[%s210_s1 + $0x28] sm:$0xff]  ;;  %v20_v11 = vld [vmem:[%s210_s1 + $0x20] sm:$0xff] }
   0x5   :  { %v19_v12 = vld [vmem:[%s210_s1 + $0x18] sm:$0xff]  ;;  %v18_v13 = vld [vmem:[%s210_s1 + $0x10] sm:$0xff]  ;;  %v17_v14 = vld [vmem:[%s210_s1 + $0x8] sm:$0xff] }
   0x6   :  { %34 = vmatpush.msra.mxu0 %v29_v2  ;;  %108 = vmatpush.msra.mxu1 %v29_v2  ;;  %v16_v15 = vld [vmem:[%s210_s1] sm:$0xff]  ;;  %v15_v17 = vld [vmem:[%s212_s0 + $0x8] sm:$0xff] }
   0x7   :  { %v14_v16 = vld [vmem:[%s212_s0] sm:$0xff] }
   0x8   :  { %35 = vmatpush.msra.mxu0 %v28_v3  ;;  %109 = vmatpush.msra.mxu1 %v28_v3  ;;  %v122_v18 = vld [vmem:[%s211_s2] ss:$0 sm:$0xff] }
   0xa   :  { %36 = vmatpush.msra.mxu0 %v27_v4  ;;  %110 = vmatpush.msra.mxu1 %v27_v4 }
   0xc   :  { %37 = vmatpush.msra.mxu0 %v26_v5  ;;  %111 = vmatpush.msra.mxu1 %v26_v5 }
   0xe   :  { %38 = vmatpush.msra.mxu0 %v25_v6  ;;  %112 = vmatpush.msra.mxu1 %v25_v6 }
  0x10   :  { %39 = vmatpush.msra.mxu0 %v24_v7  ;;  %113 = vmatpush.msra.mxu1 %v24_v7 }
  0x12   :  { %40 = vmatpush.msra.mxu0 %v23_v8  ;;  %114 = vmatpush.msra.mxu1 %v23_v8 }
  0x14   :  { %41 = vmatpush.msra.mxu0 %v22_v9  ;;  %115 = vmatpush.msra.mxu1 %v22_v9 }
  0x16   :  { %42 = vmatpush.msra.mxu0 %v21_v10  ;;  %116 = vmatpush.msra.mxu1 %v21_v10 }
  0x18   :  { %43 = vmatpush.msra.mxu0 %v20_v11  ;;  %117 = vmatpush.msra.mxu1 %v20_v11 }
  0x1a   :  { %44 = vmatpush.msra.mxu0 %v19_v12  ;;  %118 = vmatpush.msra.mxu1 %v19_v12 }
  0x1c   :  { %45 = vmatpush.msra.mxu0 %v18_v13  ;;  %119 = vmatpush.msra.mxu1 %v18_v13 }
  0x1e   :  { %46 = vmatpush.msra.mxu0 %v17_v14  ;;  %120 = vmatpush.msra.mxu1 %v17_v14 }
  0x20   :  { %47 = vmatpush.msra.mxu0 %v16_v15  ;;  %121 = vmatpush.msra.mxu1 %v16_v15 }
  0x21   :  { %48 = vmatmul.f32.vlgmr.msra.gmra.mxu0 %v14_v16  ;;  %51 = vmatmul.f32.vlgmr.msra.gmra.mxu1 %v15_v17 }
  0x9e   :  { %v49_v19 = vpop.f32.mrf.mxu0  ;;  %v52_v20 = vpop.f32.mrf.mxu1 }
  0x9f   :  { %v80_v21 = vadd.f32 %v122_v18, %v49_v19  ;;  %v81_v22 = vadd.f32 %v122_v18, %v52_v20 }
  0xa1   :  { %v84_v23 = vmul.f32 0.044715, %v80_v21  ;;  %v85_v24 = vmul.f32 0.044715, %v81_v22  ;;  %v82_v35 = vmul.f32 0.5, %v80_v21  ;;  %v83_v37 = vmul.f32 0.5, %v81_v22 }
  0xa3   :  { %v86_v25 = vmul.f32 %v84_v23, %v80_v21  ;;  %v87_v26 = vmul.f32 %v85_v24, %v81_v22 }
  0xa5   :  { %v88_v27 = vmul.f32 %v86_v25, %v80_v21  ;;  %v89_v28 = vmul.f32 %v87_v26, %v81_v22 }
  0xa7   :  { %v90_v29 = vadd.f32 %v88_v27, %v80_v21  ;;  %v91_v30 = vadd.f32 %v89_v28, %v81_v22 }
  0xa9   :  { %v92_v31 = vmul.f32 0.7978846, %v90_v29  ;;  %v93_v32 = vmul.f32 0.7978846, %v91_v30 }
  0xab   :  { %123 = vtanh.f32 %v92_v31 }
  0xac   :  { %125 = vtanh.f32 %v93_v32 }
  0xb1   :  { %v124_v33 = vpop.eup %123 }
  0xb2   :  { %v126_v34 = vpop.eup %125  ;;  %v96_v36 = vadd.f32 1.0, %v124_v33 }
  0xb3   :  { %v97_v38 = vadd.f32 1.0, %v126_v34 }
  0xb4   :  { %v98_v39 = vmul.f32 %v96_v36, %v82_v35 }
  0xb5   :  { %v99_v40 = vmul.f32 %v97_v38, %v83_v37 }
  0xb6   :  { %100 = vst [vmem:[%s213_s3] sm:$0xff] %v98_v39 }
  0xb7   :  { %101 = vst [vmem:[%s213_s3 + $0x8] sm:$0xff] %v99_v40 }

</bundles_post_ra>
